<compile_context>
chip_gen: v7x
topology: tpu7x:2x2x1
jax: 0.10.0
libtpu: 0.0.40
codegen_flags: <defaults>
</compile_context>

<pallas_src>
import jax
import jax.numpy as jnp
from jax.experimental import pallas as pl
from jax.experimental.pallas import tpu as pltpu

EPS = 1e-5  # nn.BatchNorm2d default


def basic_block_kernel(x_ref, wb1_ref, g1_ref, b1_ref, wb2_ref, g2_ref, b2_ref,
                       o_ref):
    """conv1-bn1-relu-conv2-bn2-add-relu, fused, lane-dense (rows, W*C) layout.

    x_ref   : (N, H, W*Cin)       f32   channels fused onto the lane axis
    wb*_ref : (W*Cin, 3*W*Cout)   bf16  banded conv weights (kw folded into the
                                        band, the 3 kh taps side by side)
    g*/b*   : (1, Cout)           f32   BatchNorm affine parameters
    o_ref   : (N, H, W*Cout)      f32
    """
    N, H, WCin = x_ref.shape
    C = g1_ref.shape[1]
    WC = wb1_ref.shape[1] // 3           # W * Cout (== WCin: identity residual)
    W = WC // C
    R = N * H                            # matmul rows; each row = W pixels * C
    inv_cnt = 1.0 / (N * H * W)          # BN population per channel

    x_f32 = x_ref[...].reshape(R, WCin)
    x_bf16 = x_f32.astype(jnp.bfloat16)  # cast once for the MXU

    # SAME padding in H realized by masking the +-1 row shifts (no padded
    # scratch): tap kh=0 reads row r-1 (invalid on each image's first row),
    # tap kh=2 reads row r+1 (invalid on each image's last row).
    row = jax.lax.broadcasted_iota(jnp.int32, (R, WC), 0)
    not_first = (row % H) != 0
    not_last = (row % H) != (H - 1)

    # One-hot lane<->channel matrices (lane l = pixel w*C + channel c); the BN
    # per-channel fold/broadcast runs on the otherwise idle MXU.
    lane_mod = jax.lax.broadcasted_iota(jnp.int32, (WC, C), 0) % C
    chan_col = jax.lax.broadcasted_iota(jnp.int32, (WC, C), 1)
    ch_gather = (lane_mod == chan_col).astype(jnp.float32)        # (WC, C)
    lane_mod_t = jax.lax.broadcasted_iota(jnp.int32, (C, WC), 1) % C
    chan_row = jax.lax.broadcasted_iota(jnp.int32, (C, WC), 0)
    ch_scatter = (lane_mod_t == chan_row).astype(jnp.float32)     # (C, WC)

    zero_row = jnp.zeros((1, WC), jnp.float32)

    def conv3x3(lhs_bf16, wb_ref):
        # One MXU pass: (R, W*Cin) @ (W*Cin, 3*W*Cout), f32 accumulation.
        mm = jnp.dot(lhs_bf16, wb_ref[...],
                     preferred_element_type=jnp.float32)          # (R, 3*WC)
        m0 = mm[:, 0 * WC:1 * WC]
        m1 = mm[:, 1 * WC:2 * WC]
        m2 = mm[:, 2 * WC:3 * WC]
        up = jnp.where(not_first,
                       jnp.concatenate([zero_row, m0[:R - 1, :]], axis=0), 0.0)
        dn = jnp.where(not_last,
                       jnp.concatenate([m2[1:, :], zero_row], axis=0), 0.0)
        return m1 + up + dn                                       # (R, WC) f32

    def bn_train(y, g_ref, b_ref):
        # Training-mode BatchNorm2d, biased variance, two-pass for stability.
        col = jnp.sum(y, axis=0, keepdims=True)                   # (1, WC) XLU
        mean_c = jnp.dot(col, ch_gather,
                         preferred_element_type=jnp.float32) * inv_cnt   # (1, C)
        centered = y - jnp.dot(mean_c, ch_scatter,
                               preferred_element_type=jnp.float32)
        col2 = jnp.sum(centered * centered, axis=0, keepdims=True)
        var_c = jnp.dot(col2, ch_gather,
                        preferred_element_type=jnp.float32) * inv_cnt    # (1, C)
        scale_c = g_ref[...] * jax.lax.rsqrt(var_c + EPS)
        scale_b = jnp.dot(scale_c, ch_scatter, preferred_element_type=jnp.float32)
        shift_b = jnp.dot(b_ref[...], ch_scatter, preferred_element_type=jnp.float32)
        return centered * scale_b + shift_b

    # conv1 -> bn1 -> relu  (intermediate never leaves vregs/VMEM)
    h = jnp.maximum(bn_train(conv3x3(x_bf16, wb1_ref), g1_ref, b1_ref), 0.0)

    # conv2 -> bn2 -> + identity residual -> relu
    y2 = conv3x3(h.astype(jnp.bfloat16), wb2_ref)
    out = jnp.maximum(bn_train(y2, g2_ref, b2_ref) + x_f32, 0.0)

    # Lane-dense (last dim = W*C, multiple of 128) store -> unmasked vst.
    o_ref[...] = out.reshape(N, H, WC).astype(o_ref.dtype)


def _band_weights(w_hwio, width):
    """Fold the kw taps of a 3x3 HWIO weight into banded matrices over the fused
    (w, channel) lane axis; SAME padding in W comes from the zero band edges.
    Returns (W*Cin, 3*W*Cout): the 3 kh taps concatenated along the output axis.
    """
    cin, cout = w_hwio.shape[2], w_hwio.shape[3]
    bands = []
    for kh in range(3):
        wb = jnp.zeros((width * cin, width * cout), jnp.float32)
        for kw in range(3):
            # output pixel w reads input pixel w + kw - 1
            shift = jnp.eye(width, k=1 - kw, dtype=jnp.float32)
            wb = wb + jnp.kron(shift, w_hwio[kh, kw].astype(jnp.float32))
        bands.append(wb)
    return jnp.concatenate(bands, axis=1)


def _full_spec(shape):
    zeros = (0,) * len(shape)
    return pl.BlockSpec(shape, lambda i, _z=zeros: _z)


@jax.jit
def basic_block_forward(x_nchw, params):
    """Forward of BasicBlock(in_planes, planes, stride=1, downsample=None)."""
    x = jnp.transpose(x_nchw, (0, 2, 3, 1)).astype(jnp.float32)      # NHWC
    N, H, W, cin = x.shape
    planes = params["w1"].shape[-1]
    assert cin == planes, "identity residual requires in_planes == planes"

    # Weights pre-banded + pre-cast to bf16 in the wrapper (halves weight DMA,
    # no in-kernel per-tap casts).
    wb1 = _band_weights(params["w1"], W).astype(jnp.bfloat16)
    wb2 = _band_weights(params["w2"], W).astype(jnp.bfloat16)
    g1 = params["g1"].reshape(1, planes).astype(jnp.float32)
    b1 = params["b1"].reshape(1, planes).astype(jnp.float32)
    g2 = params["g2"].reshape(1, planes).astype(jnp.float32)
    b2 = params["b2"].reshape(1, planes).astype(jnp.float32)

    x_flat = x.reshape(N, H, W * cin)      # channels fused onto the lane axis

    args = (x_flat, wb1, g1, b1, wb2, g2, b2)
    out = pl.pallas_call(
        basic_block_kernel,
        out_shape=jax.ShapeDtypeStruct((N, H, W * planes), jnp.float32),
        grid=(1,),
        in_specs=[_full_spec(a.shape) for a in args],
        out_specs=_full_spec((N, H, W * planes)),
        compiler_params=pltpu.CompilerParams(
            dimension_semantics=("arbitrary",),
            vmem_limit_bytes=32 * 1024 * 1024),
    )(*args)

    return jnp.transpose(out.reshape(N, H, W, planes), (0, 3, 1, 2))   # NCHW


# ---------------- pure-JAX reference (for correctness check) ----------------
def _reference(x_nchw, params):
    x = jnp.transpose(x_nchw, (0, 2, 3, 1))

    def conv(a, w):
        return jax.lax.conv_general_dilated(
            a, w, window_strides=(1, 1), padding="SAME",
            dimension_numbers=("NHWC", "HWIO", "NHWC"))

    def bn(a, g, b):
        m = jnp.mean(a, axis=(0, 1, 2), keepdims=True)
        v = jnp.mean((a - m) ** 2, axis=(0, 1, 2), keepdims=True)
        return (a - m) * jax.lax.rsqrt(v + EPS) * g.reshape(1, 1, 1, -1) \
            + b.reshape(1, 1, 1, -1)

    h = jax.nn.relu(bn(conv(x, params["w1"]), params["g1"], params["b1"]))
    o = jax.nn.relu(bn(conv(h, params["w2"]), params["g2"], params["b2"]) + x)
    return jnp.transpose(o, (0, 3, 1, 2))


if __name__ == "__main__":
    key = jax.random.PRNGKey(0)
    N, C, H, W = 2, 8, 16, 16          # in_planes == planes == 8, stride=1
    planes = C

    k = jax.random.split(key, 7)
    x = jax.random.normal(k[0], (N, C, H, W), jnp.float32)
    params = {
        "w1": 0.1 * jax.random.normal(k[1], (3, 3, C, planes), jnp.float32),
        "w2": 0.1 * jax.random.normal(k[2], (3, 3, planes, planes), jnp.float32),
        "g1": 1.0 + 0.1 * jax.random.normal(k[3], (1, planes), jnp.float32),
        "b1": 0.1 * jax.random.normal(k[4], (1, planes), jnp.float32),
        "g2": 1.0 + 0.1 * jax.random.normal(k[5], (1, planes), jnp.float32),
        "b2": 0.1 * jax.random.normal(k[6], (1, planes), jnp.float32),
    }

    out = jax.block_until_ready(basic_block_forward(x, params))
    ref = jax.block_until_ready(_reference(x, params))

    assert out.shape == (N, planes, H, W), out.shape
    # bf16 MXU operands with f32 accumulation -> bf16-level tolerance; any
    # structural bug (padding / shifts / BN / residual) gives O(0.1-1) errors.
    err = float(jnp.max(jnp.abs(out - ref)))
    assert jnp.allclose(out, ref, atol=5e-2, rtol=5e-2), err

    print("KERNEL_OK")
</pallas_src>

<mosaic_0001>
module attributes {stable_mosaic.version = 11 : i64} {
  func.func @basic_block_kernel(%arg0: i32, %arg1: memref<2x16x128xf32, #tpu.memory_space<vmem>>, %arg2: memref<128x384xbf16, #tpu.memory_space<vmem>>, %arg3: memref<1x8xf32, #tpu.memory_space<vmem>>, %arg4: memref<1x8xf32, #tpu.memory_space<vmem>>, %arg5: memref<128x384xbf16, #tpu.memory_space<vmem>>, %arg6: memref<1x8xf32, #tpu.memory_space<vmem>>, %arg7: memref<1x8xf32, #tpu.memory_space<vmem>>, %arg8: memref<2x16x128xf32, #tpu.memory_space<vmem>>) attributes {dimension_semantics = [#tpu.dimension_semantics<arbitrary>], iteration_bounds = array<i64: 1>, scalar_prefetch = 0 : i64, scratch_operands = 0 : i64, tpu.core_type = #tpu.core_type<tc>, window_params = [{pipeline_mode = #tpu.pipeline_mode<synchronous>, transform_indices = @transform_0, window_bounds = array<i64: 2, 16, 128>}, {pipeline_mode = #tpu.pipeline_mode<synchronous>, transform_indices = @transform_1, window_bounds = array<i64: 128, 384>}, {pipeline_mode = #tpu.pipeline_mode<synchronous>, transform_indices = @transform_2, window_bounds = array<i64: 1, 8>}, {pipeline_mode = #tpu.pipeline_mode<synchronous>, transform_indices = @transform_3, window_bounds = array<i64: 1, 8>}, {pipeline_mode = #tpu.pipeline_mode<synchronous>, transform_indices = @transform_4, window_bounds = array<i64: 128, 384>}, {pipeline_mode = #tpu.pipeline_mode<synchronous>, transform_indices = @transform_5, window_bounds = array<i64: 1, 8>}, {pipeline_mode = #tpu.pipeline_mode<synchronous>, transform_indices = @transform_6, window_bounds = array<i64: 1, 8>}, {pipeline_mode = #tpu.pipeline_mode<synchronous>, transform_indices = @transform_7, window_bounds = array<i64: 2, 16, 128>}]} {
    %c0 = arith.constant 0 : index
    %c0_0 = arith.constant 0 : index
    %c0_1 = arith.constant 0 : index
    %0 = vector.load %arg1[%c0, %c0_0, %c0_1] : memref<2x16x128xf32, #tpu.memory_space<vmem>>, vector<2x16x128xf32>
    %1 = vector.shape_cast %0 : vector<2x16x128xf32> to vector<32x128xf32>
    %2 = arith.truncf %1 : vector<32x128xf32> to vector<32x128xbf16>
    %3 = tpu.iota {dimensions = array<i32: 0>} : vector<32x128xi32>
    %c16_i32 = arith.constant 16 : i32
    %c0_i32 = arith.constant 0 : i32
    %4 = arith.cmpi eq, %c16_i32, %c0_i32 : i32
    %c1_i32 = arith.constant 1 : i32
    %5 = arith.select %4, %c1_i32, %c16_i32 : i32
    %6 = vector.broadcast %5 : i32 to vector<32x128xi32>
    %7 = arith.remsi %3, %6 : vector<32x128xi32>
    %c0_i32_2 = arith.constant 0 : i32
    %8 = vector.broadcast %c0_i32_2 : i32 to vector<32x128xi32>
    %9 = arith.cmpi ne, %7, %8 : vector<32x128xi32>
    %c0_i32_3 = arith.constant 0 : i32
    %10 = vector.broadcast %c0_i32_3 : i32 to vector<32x128xi32>
    %11 = arith.cmpi slt, %7, %10 : vector<32x128xi32>
    %c0_i32_4 = arith.constant 0 : i32
    %12 = arith.cmpi slt, %5, %c0_i32_4 : i32
    %13 = vector.broadcast %12 : i1 to vector<32x128xi1>
    %14 = vector.broadcast %13 : vector<32x128xi1> to vector<32x128xi1>
    %15 = arith.xori %11, %14 : vector<32x128xi1>
    %16 = arith.andi %15, %9 : vector<32x128xi1>
    %17 = vector.broadcast %5 : i32 to vector<32x128xi32>
    %18 = arith.addi %7, %17 : vector<32x128xi32>
    %19 = arith.select %16, %18, %7 : vector<32x128xi1>, vector<32x128xi32>
    %c0_i32_5 = arith.constant 0 : i32
    %20 = vector.broadcast %c0_i32_5 : i32 to vector<32x128xi32>
    %21 = arith.cmpi ne, %19, %20 : vector<32x128xi32>
    %c16_i32_6 = arith.constant 16 : i32
    %c0_i32_7 = arith.constant 0 : i32
    %22 = arith.cmpi eq, %c16_i32_6, %c0_i32_7 : i32
    %c1_i32_8 = arith.constant 1 : i32
    %23 = arith.select %22, %c1_i32_8, %c16_i32_6 : i32
    %24 = vector.broadcast %23 : i32 to vector<32x128xi32>
    %25 = arith.remsi %3, %24 : vector<32x128xi32>
    %c0_i32_9 = arith.constant 0 : i32
    %26 = vector.broadcast %c0_i32_9 : i32 to vector<32x128xi32>
    %27 = arith.cmpi ne, %25, %26 : vector<32x128xi32>
    %c0_i32_10 = arith.constant 0 : i32
    %28 = vector.broadcast %c0_i32_10 : i32 to vector<32x128xi32>
    %29 = arith.cmpi slt, %25, %28 : vector<32x128xi32>
    %c0_i32_11 = arith.constant 0 : i32
    %30 = arith.cmpi slt, %23, %c0_i32_11 : i32
    %31 = vector.broadcast %30 : i1 to vector<32x128xi1>
    %32 = vector.broadcast %31 : vector<32x128xi1> to vector<32x128xi1>
    %33 = arith.xori %29, %32 : vector<32x128xi1>
    %34 = arith.andi %33, %27 : vector<32x128xi1>
    %35 = vector.broadcast %23 : i32 to vector<32x128xi32>
    %36 = arith.addi %25, %35 : vector<32x128xi32>
    %37 = arith.select %34, %36, %25 : vector<32x128xi1>, vector<32x128xi32>
    %c15_i32 = arith.constant 15 : i32
    %38 = vector.broadcast %c15_i32 : i32 to vector<32x128xi32>
    %39 = arith.cmpi ne, %37, %38 : vector<32x128xi32>
    %40 = tpu.iota {dimensions = array<i32: 0>} : vector<128x8xi32>
    %c8_i32 = arith.constant 8 : i32
    %c0_i32_12 = arith.constant 0 : i32
    %41 = arith.cmpi eq, %c8_i32, %c0_i32_12 : i32
    %c1_i32_13 = arith.constant 1 : i32
    %42 = arith.select %41, %c1_i32_13, %c8_i32 : i32
    %43 = vector.broadcast %42 : i32 to vector<128x8xi32>
    %44 = arith.remsi %40, %43 : vector<128x8xi32>
    %c0_i32_14 = arith.constant 0 : i32
    %45 = vector.broadcast %c0_i32_14 : i32 to vector<128x8xi32>
    %46 = arith.cmpi ne, %44, %45 : vector<128x8xi32>
    %c0_i32_15 = arith.constant 0 : i32
    %47 = vector.broadcast %c0_i32_15 : i32 to vector<128x8xi32>
    %48 = arith.cmpi slt, %44, %47 : vector<128x8xi32>
    %c0_i32_16 = arith.constant 0 : i32
    %49 = arith.cmpi slt, %42, %c0_i32_16 : i32
    %50 = vector.broadcast %49 : i1 to vector<128x8xi1>
    %51 = vector.broadcast %50 : vector<128x8xi1> to vector<128x8xi1>
    %52 = arith.xori %48, %51 : vector<128x8xi1>
    %53 = arith.andi %52, %46 : vector<128x8xi1>
    %54 = vector.broadcast %42 : i32 to vector<128x8xi32>
    %55 = arith.addi %44, %54 : vector<128x8xi32>
    %56 = arith.select %53, %55, %44 : vector<128x8xi1>, vector<128x8xi32>
    %57 = tpu.iota {dimensions = array<i32: 1>} : vector<128x8xi32>
    %58 = arith.cmpi eq, %56, %57 : vector<128x8xi32>
    %59 = arith.extui %58 : vector<128x8xi1> to vector<128x8xi32>
    %60 = arith.sitofp %59 : vector<128x8xi32> to vector<128x8xf32>
    %61 = tpu.iota {dimensions = array<i32: 1>} : vector<8x128xi32>
    %c8_i32_17 = arith.constant 8 : i32
    %c0_i32_18 = arith.constant 0 : i32
    %62 = arith.cmpi eq, %c8_i32_17, %c0_i32_18 : i32
    %c1_i32_19 = arith.constant 1 : i32
    %63 = arith.select %62, %c1_i32_19, %c8_i32_17 : i32
    %64 = vector.broadcast %63 : i32 to vector<8x128xi32>
    %65 = arith.remsi %61, %64 : vector<8x128xi32>
    %c0_i32_20 = arith.constant 0 : i32
    %66 = vector.broadcast %c0_i32_20 : i32 to vector<8x128xi32>
    %67 = arith.cmpi ne, %65, %66 : vector<8x128xi32>
    %c0_i32_21 = arith.constant 0 : i32
    %68 = vector.broadcast %c0_i32_21 : i32 to vector<8x128xi32>
    %69 = arith.cmpi slt, %65, %68 : vector<8x128xi32>
    %c0_i32_22 = arith.constant 0 : i32
    %70 = arith.cmpi slt, %63, %c0_i32_22 : i32
    %71 = vector.broadcast %70 : i1 to vector<8x128xi1>
    %72 = vector.broadcast %71 : vector<8x128xi1> to vector<8x128xi1>
    %73 = arith.xori %69, %72 : vector<8x128xi1>
    %74 = arith.andi %73, %67 : vector<8x128xi1>
    %75 = vector.broadcast %63 : i32 to vector<8x128xi32>
    %76 = arith.addi %65, %75 : vector<8x128xi32>
    %77 = arith.select %74, %76, %65 : vector<8x128xi1>, vector<8x128xi32>
    %78 = tpu.iota {dimensions = array<i32: 0>} : vector<8x128xi32>
    %79 = arith.cmpi eq, %77, %78 : vector<8x128xi32>
    %80 = arith.extui %79 : vector<8x128xi1> to vector<8x128xi32>
    %81 = arith.sitofp %80 : vector<8x128xi32> to vector<8x128xf32>
    %cst = arith.constant 0.000000e+00 : f32
    %82 = vector.broadcast %cst : f32 to vector<1x128xf32>
    %c0_23 = arith.constant 0 : index
    %c0_24 = arith.constant 0 : index
    %83 = vector.load %arg2[%c0_23, %c0_24] : memref<128x384xbf16, #tpu.memory_space<vmem>>, vector<128x384xbf16>
    %cst_25 = arith.constant dense<0.000000e+00> : vector<32x384xf32>
    %84 = tpu.matmul %2, %83, %cst_25 {dimension_numbers = #tpu.dot_dimension_numbers<[1], [0], [0], [1], [0, 0, 1, 1], [], []>} : vector<32x128xbf16>, vector<128x384xbf16>, vector<32x384xf32> -> vector<32x384xf32>
    %85 = vector.extract_strided_slice %84 {offsets = [0, 0], sizes = [32, 128], strides = [1, 1]} : vector<32x384xf32> to vector<32x128xf32>
    %86 = vector.extract_strided_slice %84 {offsets = [0, 128], sizes = [32, 128], strides = [1, 1]} : vector<32x384xf32> to vector<32x128xf32>
    %87 = vector.extract_strided_slice %84 {offsets = [0, 256], sizes = [32, 128], strides = [1, 1]} : vector<32x384xf32> to vector<32x128xf32>
    %88 = vector.extract_strided_slice %85 {offsets = [0, 0], sizes = [31, 128], strides = [1, 1]} : vector<32x128xf32> to vector<31x128xf32>
    %89 = tpu.concatenate %82, %88 in 0 : vector<1x128xf32>, vector<31x128xf32> -> vector<32x128xf32>
    %cst_26 = arith.constant 0.000000e+00 : f32
    %90 = vector.broadcast %cst_26 : f32 to vector<32x128xf32>
    %91 = arith.select %21, %89, %90 : vector<32x128xi1>, vector<32x128xf32>
    %92 = vector.extract_strided_slice %87 {offsets = [1, 0], sizes = [31, 128], strides = [1, 1]} : vector<32x128xf32> to vector<31x128xf32>
    %93 = tpu.concatenate %92, %82 in 0 : vector<31x128xf32>, vector<1x128xf32> -> vector<32x128xf32>
    %cst_27 = arith.constant 0.000000e+00 : f32
    %94 = vector.broadcast %cst_27 : f32 to vector<32x128xf32>
    %95 = arith.select %39, %93, %94 : vector<32x128xi1>, vector<32x128xf32>
    %96 = arith.addf %86, %91 : vector<32x128xf32>
    %97 = arith.addf %96, %95 : vector<32x128xf32>
    %cst_28 = arith.constant dense<0.000000e+00> : vector<128xf32>
    %98 = vector.multi_reduction <add>, %97, %cst_28 [0] : vector<32x128xf32> to vector<128xf32>
    %99 = vector.shape_cast %98 : vector<128xf32> to vector<1x128xf32>
    %cst_29 = arith.constant dense<0.000000e+00> : vector<1x8xf32>
    %100 = tpu.matmul %99, %60, %cst_29 {dimension_numbers = #tpu.dot_dimension_numbers<[1], [0], [0], [1], [0, 0, 1, 1], [], []>} : vector<1x128xf32>, vector<128x8xf32>, vector<1x8xf32> -> vector<1x8xf32>
    %cst_30 = arith.constant 0.001953125 : f32
    %101 = vector.broadcast %cst_30 : f32 to vector<1x8xf32>
    %102 = arith.mulf %100, %101 : vector<1x8xf32>
    %cst_31 = arith.constant dense<0.000000e+00> : vector<1x128xf32>
    %103 = tpu.matmul %102, %81, %cst_31 {dimension_numbers = #tpu.dot_dimension_numbers<[1], [0], [0], [1], [0, 0, 1, 1], [], []>} : vector<1x8xf32>, vector<8x128xf32>, vector<1x128xf32> -> vector<1x128xf32>
    %104 = vector.broadcast %103 : vector<1x128xf32> to vector<32x128xf32>
    %105 = arith.subf %97, %104 : vector<32x128xf32>
    %106 = arith.mulf %105, %105 : vector<32x128xf32>
    %cst_32 = arith.constant dense<0.000000e+00> : vector<128xf32>
    %107 = vector.multi_reduction <add>, %106, %cst_32 [0] : vector<32x128xf32> to vector<128xf32>
    %108 = vector.shape_cast %107 : vector<128xf32> to vector<1x128xf32>
    %cst_33 = arith.constant dense<0.000000e+00> : vector<1x8xf32>
    %109 = tpu.matmul %108, %60, %cst_33 {dimension_numbers = #tpu.dot_dimension_numbers<[1], [0], [0], [1], [0, 0, 1, 1], [], []>} : vector<1x128xf32>, vector<128x8xf32>, vector<1x8xf32> -> vector<1x8xf32>
    %cst_34 = arith.constant 0.001953125 : f32
    %110 = vector.broadcast %cst_34 : f32 to vector<1x8xf32>
    %111 = arith.mulf %109, %110 : vector<1x8xf32>
    %c0_35 = arith.constant 0 : index
    %c0_36 = arith.constant 0 : index
    %112 = vector.load %arg3[%c0_35, %c0_36] : memref<1x8xf32, #tpu.memory_space<vmem>>, vector<1x8xf32>
    %cst_37 = arith.constant 9.99999974E-6 : f32
    %113 = vector.broadcast %cst_37 : f32 to vector<1x8xf32>
    %114 = arith.addf %111, %113 : vector<1x8xf32>
    %115 = math.rsqrt %114 : vector<1x8xf32>
    %116 = arith.mulf %112, %115 : vector<1x8xf32>
    %cst_38 = arith.constant dense<0.000000e+00> : vector<1x128xf32>
    %117 = tpu.matmul %116, %81, %cst_38 {dimension_numbers = #tpu.dot_dimension_numbers<[1], [0], [0], [1], [0, 0, 1, 1], [], []>} : vector<1x8xf32>, vector<8x128xf32>, vector<1x128xf32> -> vector<1x128xf32>
    %c0_39 = arith.constant 0 : index
    %c0_40 = arith.constant 0 : index
    %118 = vector.load %arg4[%c0_39, %c0_40] : memref<1x8xf32, #tpu.memory_space<vmem>>, vector<1x8xf32>
    %cst_41 = arith.constant dense<0.000000e+00> : vector<1x128xf32>
    %119 = tpu.matmul %118, %81, %cst_41 {dimension_numbers = #tpu.dot_dimension_numbers<[1], [0], [0], [1], [0, 0, 1, 1], [], []>} : vector<1x8xf32>, vector<8x128xf32>, vector<1x128xf32> -> vector<1x128xf32>
    %120 = vector.broadcast %117 : vector<1x128xf32> to vector<32x128xf32>
    %121 = arith.mulf %105, %120 : vector<32x128xf32>
    %122 = vector.broadcast %119 : vector<1x128xf32> to vector<32x128xf32>
    %123 = arith.addf %121, %122 : vector<32x128xf32>
    %cst_42 = arith.constant 0.000000e+00 : f32
    %124 = vector.broadcast %cst_42 : f32 to vector<32x128xf32>
    %125 = arith.maximumf %123, %124 : vector<32x128xf32>
    %126 = arith.truncf %125 : vector<32x128xf32> to vector<32x128xbf16>
    %c0_43 = arith.constant 0 : index
    %c0_44 = arith.constant 0 : index
    %127 = vector.load %arg5[%c0_43, %c0_44] : memref<128x384xbf16, #tpu.memory_space<vmem>>, vector<128x384xbf16>
    %cst_45 = arith.constant dense<0.000000e+00> : vector<32x384xf32>
    %128 = tpu.matmul %126, %127, %cst_45 {dimension_numbers = #tpu.dot_dimension_numbers<[1], [0], [0], [1], [0, 0, 1, 1], [], []>} : vector<32x128xbf16>, vector<128x384xbf16>, vector<32x384xf32> -> vector<32x384xf32>
    %129 = vector.extract_strided_slice %128 {offsets = [0, 0], sizes = [32, 128], strides = [1, 1]} : vector<32x384xf32> to vector<32x128xf32>
    %130 = vector.extract_strided_slice %128 {offsets = [0, 128], sizes = [32, 128], strides = [1, 1]} : vector<32x384xf32> to vector<32x128xf32>
    %131 = vector.extract_strided_slice %128 {offsets = [0, 256], sizes = [32, 128], strides = [1, 1]} : vector<32x384xf32> to vector<32x128xf32>
    %132 = vector.extract_strided_slice %129 {offsets = [0, 0], sizes = [31, 128], strides = [1, 1]} : vector<32x128xf32> to vector<31x128xf32>
    %133 = tpu.concatenate %82, %132 in 0 : vector<1x128xf32>, vector<31x128xf32> -> vector<32x128xf32>
    %cst_46 = arith.constant 0.000000e+00 : f32
    %134 = vector.broadcast %cst_46 : f32 to vector<32x128xf32>
    %135 = arith.select %21, %133, %134 : vector<32x128xi1>, vector<32x128xf32>
    %136 = vector.extract_strided_slice %131 {offsets = [1, 0], sizes = [31, 128], strides = [1, 1]} : vector<32x128xf32> to vector<31x128xf32>
    %137 = tpu.concatenate %136, %82 in 0 : vector<31x128xf32>, vector<1x128xf32> -> vector<32x128xf32>
    %cst_47 = arith.constant 0.000000e+00 : f32
    %138 = vector.broadcast %cst_47 : f32 to vector<32x128xf32>
    %139 = arith.select %39, %137, %138 : vector<32x128xi1>, vector<32x128xf32>
    %140 = arith.addf %130, %135 : vector<32x128xf32>
    %141 = arith.addf %140, %139 : vector<32x128xf32>
    %cst_48 = arith.constant dense<0.000000e+00> : vector<128xf32>
    %142 = vector.multi_reduction <add>, %141, %cst_48 [0] : vector<32x128xf32> to vector<128xf32>
    %143 = vector.shape_cast %142 : vector<128xf32> to vector<1x128xf32>
    %cst_49 = arith.constant dense<0.000000e+00> : vector<1x8xf32>
    %144 = tpu.matmul %143, %60, %cst_49 {dimension_numbers = #tpu.dot_dimension_numbers<[1], [0], [0], [1], [0, 0, 1, 1], [], []>} : vector<1x128xf32>, vector<128x8xf32>, vector<1x8xf32> -> vector<1x8xf32>
    %cst_50 = arith.constant 0.001953125 : f32
    %145 = vector.broadcast %cst_50 : f32 to vector<1x8xf32>
    %146 = arith.mulf %144, %145 : vector<1x8xf32>
    %cst_51 = arith.constant dense<0.000000e+00> : vector<1x128xf32>
    %147 = tpu.matmul %146, %81, %cst_51 {dimension_numbers = #tpu.dot_dimension_numbers<[1], [0], [0], [1], [0, 0, 1, 1], [], []>} : vector<1x8xf32>, vector<8x128xf32>, vector<1x128xf32> -> vector<1x128xf32>
    %148 = vector.broadcast %147 : vector<1x128xf32> to vector<32x128xf32>
    %149 = arith.subf %141, %148 : vector<32x128xf32>
    %150 = arith.mulf %149, %149 : vector<32x128xf32>
    %cst_52 = arith.constant dense<0.000000e+00> : vector<128xf32>
    %151 = vector.multi_reduction <add>, %150, %cst_52 [0] : vector<32x128xf32> to vector<128xf32>
    %152 = vector.shape_cast %151 : vector<128xf32> to vector<1x128xf32>
    %cst_53 = arith.constant dense<0.000000e+00> : vector<1x8xf32>
    %153 = tpu.matmul %152, %60, %cst_53 {dimension_numbers = #tpu.dot_dimension_numbers<[1], [0], [0], [1], [0, 0, 1, 1], [], []>} : vector<1x128xf32>, vector<128x8xf32>, vector<1x8xf32> -> vector<1x8xf32>
    %cst_54 = arith.constant 0.001953125 : f32
    %154 = vector.broadcast %cst_54 : f32 to vector<1x8xf32>
    %155 = arith.mulf %153, %154 : vector<1x8xf32>
    %c0_55 = arith.constant 0 : index
    %c0_56 = arith.constant 0 : index
    %156 = vector.load %arg6[%c0_55, %c0_56] : memref<1x8xf32, #tpu.memory_space<vmem>>, vector<1x8xf32>
    %cst_57 = arith.constant 9.99999974E-6 : f32
    %157 = vector.broadcast %cst_57 : f32 to vector<1x8xf32>
    %158 = arith.addf %155, %157 : vector<1x8xf32>
    %159 = math.rsqrt %158 : vector<1x8xf32>
    %160 = arith.mulf %156, %159 : vector<1x8xf32>
    %cst_58 = arith.constant dense<0.000000e+00> : vector<1x128xf32>
    %161 = tpu.matmul %160, %81, %cst_58 {dimension_numbers = #tpu.dot_dimension_numbers<[1], [0], [0], [1], [0, 0, 1, 1], [], []>} : vector<1x8xf32>, vector<8x128xf32>, vector<1x128xf32> -> vector<1x128xf32>
    %c0_59 = arith.constant 0 : index
    %c0_60 = arith.constant 0 : index
    %162 = vector.load %arg7[%c0_59, %c0_60] : memref<1x8xf32, #tpu.memory_space<vmem>>, vector<1x8xf32>
    %cst_61 = arith.constant dense<0.000000e+00> : vector<1x128xf32>
    %163 = tpu.matmul %162, %81, %cst_61 {dimension_numbers = #tpu.dot_dimension_numbers<[1], [0], [0], [1], [0, 0, 1, 1], [], []>} : vector<1x8xf32>, vector<8x128xf32>, vector<1x128xf32> -> vector<1x128xf32>
    %164 = vector.broadcast %161 : vector<1x128xf32> to vector<32x128xf32>
    %165 = arith.mulf %149, %164 : vector<32x128xf32>
    %166 = vector.broadcast %163 : vector<1x128xf32> to vector<32x128xf32>
    %167 = arith.addf %165, %166 : vector<32x128xf32>
    %168 = arith.addf %167, %1 : vector<32x128xf32>
    %cst_62 = arith.constant 0.000000e+00 : f32
    %169 = vector.broadcast %cst_62 : f32 to vector<32x128xf32>
    %170 = arith.maximumf %168, %169 : vector<32x128xf32>
    %171 = vector.shape_cast %170 : vector<32x128xf32> to vector<2x16x128xf32>
    %c0_63 = arith.constant 0 : index
    %c0_64 = arith.constant 0 : index
    %c0_65 = arith.constant 0 : index
    %172 = vector.load %arg8[%c0_63, %c0_64, %c0_65] : memref<2x16x128xf32, #tpu.memory_space<vmem>>, vector<2x16x128xf32>
    tpu.vector_store %arg8[%c0_63, %c0_64, %c0_65], %171 {strides = array<i32>} : memref<2x16x128xf32, #tpu.memory_space<vmem>>, vector<2x16x128xf32>,
    return
  }
  func.func @transform_0(%arg0: i32) -> (i32, i32, i32) {
    %c0_i32 = arith.constant 0 : i32
    %c0_i32_0 = arith.constant 0 : i32
    %c0_i32_1 = arith.constant 0 : i32
    %c0_i32_2 = arith.constant 0 : i32
    return %c0_i32, %c0_i32_0, %c0_i32_1 : i32, i32, i32
  }
  func.func @transform_1(%arg0: i32) -> (i32, i32) {
    %c0_i32 = arith.constant 0 : i32
    %c0_i32_0 = arith.constant 0 : i32
    %c0_i32_1 = arith.constant 0 : i32
    return %c0_i32, %c0_i32_0 : i32, i32
  }
  func.func @transform_2(%arg0: i32) -> (i32, i32) {
    %c0_i32 = arith.constant 0 : i32
    %c0_i32_0 = arith.constant 0 : i32
    %c0_i32_1 = arith.constant 0 : i32
    return %c0_i32, %c0_i32_0 : i32, i32
  }
  func.func @transform_3(%arg0: i32) -> (i32, i32) {
    %c0_i32 = arith.constant 0 : i32
    %c0_i32_0 = arith.constant 0 : i32
    %c0_i32_1 = arith.constant 0 : i32
    return %c0_i32, %c0_i32_0 : i32, i32
  }
  func.func @transform_4(%arg0: i32) -> (i32, i32) {
    %c0_i32 = arith.constant 0 : i32
    %c0_i32_0 = arith.constant 0 : i32
    %c0_i32_1 = arith.constant 0 : i32
    return %c0_i32, %c0_i32_0 : i32, i32
  }
  func.func @transform_5(%arg0: i32) -> (i32, i32) {
    %c0_i32 = arith.constant 0 : i32
    %c0_i32_0 = arith.constant 0 : i32
    %c0_i32_1 = arith.constant 0 : i32
    return %c0_i32, %c0_i32_0 : i32, i32
  }
  func.func @transform_6(%arg0: i32) -> (i32, i32) {
    %c0_i32 = arith.constant 0 : i32
    %c0_i32_0 = arith.constant 0 : i32
    %c0_i32_1 = arith.constant 0 : i32
    return %c0_i32, %c0_i32_0 : i32, i32
  }
  func.func @transform_7(%arg0: i32) -> (i32, i32, i32) {
    %c0_i32 = arith.constant 0 : i32
    %c0_i32_0 = arith.constant 0 : i32
    %c0_i32_1 = arith.constant 0 : i32
    %c0_i32_2 = arith.constant 0 : i32
    return %c0_i32, %c0_i32_0, %c0_i32_1 : i32, i32, i32
  }
}

</mosaic_0001>

<bundles_post_ra>
// kernel: basic_block_forward.1
= control target key start
LH: loop header
LB: loop body
LE: loop exit
PB: predicated region body
PF: predicated region fallthrough
CT: control target
= control target key end

     0   :  { %v2453_v1 = vmov 0   ;;  %v33_v31 = vlaneseq  ;;  %v2454_v38 = vmov 0.0|0.0   ;;  %v2455_v41 = vmov 1.0|1.0   ;;  %s3041_s1 = inlined_call_operand.vmem [shape: bf16[128,384], index: 1, kind: input, shape index: {}]   ;;  %s3042_s0 = inlined_call_operand.vmem [shape: f32[2,16,128], index: 0, kind: input, shape index: {}]   ;;  %s3043_s4 = inlined_call_operand.vmem [shape: bf16[128,384], index: 4, kind: input, shape index: {}]   ;;  %s3044_s2 = inlined_call_operand.vmem [shape: f32[1,8], index: 2, kind: input, shape index: {}]   ;;  %s3045_s3 = inlined_call_operand.vmem [shape: f32[1,8], index: 3, kind: input, shape index: {}]   ;;  %s3046_s5 = inlined_call_operand.vmem [shape: f32[1,8], index: 5, kind: input, shape index: {}]   ;;  %s3047_s6 = inlined_call_operand.vmem [shape: f32[1,8], index: 6, kind: input, shape index: {}]   ;;  %s3048_s7 = inlined_call_operand.vmem [shape: f32[2,16,128], index: 7, kind: output, shape index: {}]  }
   0x1   :  { %v2385_v0 = vld [vmem:[%s3041_s1 + $0x4] ss:$12 sps:$4 sm:$0xff]   ;;  %555 = vmatprep.mubr.bf16.mxu0 %v2453_v1  ;;  %v2387_v2 = vld [vmem:[%s3041_s1 + $0x8] ss:$12 sps:$4 sm:$0xff]   ;;  %v2388_v3 = vld [vmem:[%s3041_s1] ss:$12 sps:$4 sm:$0xff]  }
   0x2   :  { %523 = vmatprep.subr.bf16.mxu0 %v2385_v0  ;;  %2073 = vmatprep.subr.bf16.mxu1 %v2387_v2  ;;  %v2389_v4 = vld [vmem:[%s3041_s1 + $0x1c] ss:$12 sps:$4 sm:$0xff]   ;;  %v2391_v5 = vld [vmem:[%s3041_s1 + $0x20] ss:$12 sps:$4 sm:$0xff]   ;;  %v2392_v6 = vld [vmem:[%s3041_s1 + $0x18] ss:$12 sps:$4 sm:$0xff]  }
   0x3   :  { %524 = vmatpush1.bf16.msra.mxu0 %v2388_v3  ;;  %2074 = vmatpush3.bf16.msra.mxu1 %v2387_v2  ;;  %v2393_v7 = vld [vmem:[%s3041_s1 + $0x34] ss:$12 sps:$4 sm:$0xff]   ;;  %v2395_v8 = vld [vmem:[%s3041_s1 + $0x38] ss:$12 sps:$4 sm:$0xff]   ;;  %v2396_v9 = vld [vmem:[%s3041_s1 + $0x30] ss:$12 sps:$4 sm:$0xff]  }
   0x4   :  { %525 = vmatprep.subr.bf16.mxu0 %v2389_v4  ;;  %2075 = vmatprep.subr.bf16.mxu1 %v2391_v5  ;;  %v2397_v10 = vld [vmem:[%s3041_s1 + $0x4c] ss:$12 sps:$4 sm:$0xff]   ;;  %v2399_v11 = vld [vmem:[%s3041_s1 + $0x50] ss:$12 sps:$4 sm:$0xff]   ;;  %v2400_v12 = vld [vmem:[%s3041_s1 + $0x48] ss:$12 sps:$4 sm:$0xff]  }
   0x5   :  { %v2401_v13 = vld [vmem:[%s3041_s1 + $0x64] ss:$12 sps:$4 sm:$0xff]   ;;  %v2403_v14 = vld [vmem:[%s3041_s1 + $0x68] ss:$12 sps:$4 sm:$0xff]   ;;  %v2404_v15 = vld [vmem:[%s3041_s1 + $0x60] ss:$12 sps:$4 sm:$0xff]  }
   0x6   :  { %v2405_v16 = vld [vmem:[%s3041_s1 + $0x7c] ss:$12 sps:$4 sm:$0xff]   ;;  %v2407_v17 = vld [vmem:[%s3041_s1 + $0x80] ss:$12 sps:$4 sm:$0xff]   ;;  %v2408_v20 = vld [vmem:[%s3041_s1 + $0x78] ss:$12 sps:$4 sm:$0xff]  }
   0x7   :  { %526 = vmatpush1.bf16.msra.mxu0 %v2392_v6  ;;  %2076 = vmatpush3.bf16.msra.mxu1 %v2391_v5  ;;  %v2554_v18 = vld [vmem:[%s3042_s0] sm:$0xff]  ;;  %v2559_v19 = vld [vmem:[%s3042_s0 + $0x8] sm:$0xff]  ;;  %v2412_v24 = vld [vmem:[%s3041_s1 + $0x90] ss:$12 sps:$4 sm:$0xff]   ;;  %v2597_v32 = vshrl.u32 %v33_v31, 7  ;;  %v2604_v36 = vand.u32 127, %v33_v31 }
   0x8   :  { %527 = vmatprep.subr.bf16.mxu0 %v2393_v7  ;;  %2077 = vmatprep.subr.bf16.mxu1 %v2395_v8  ;;  %v31_v21 = vpack.c.bf16 %v2559_v19, %v2554_v18  ;;  %v2409_v22 = vld [vmem:[%s3041_s1 + $0x94] ss:$12 sps:$4 sm:$0xff]   ;;  %v2411_v23 = vld [vmem:[%s3041_s1 + $0x98] ss:$12 sps:$4 sm:$0xff]   ;;  %v2415_v26 = vld [vmem:[%s3041_s1 + $0xb0] ss:$12 sps:$4 sm:$0xff]  }
   0x9   :  { %v2413_v25 = vld [vmem:[%s3041_s1 + $0xac] ss:$12 sps:$4 sm:$0xff]   ;;  %v2416_v27 = vld [vmem:[%s3041_s1 + $0xa8] ss:$12 sps:$4 sm:$0xff]   ;;  %v2600_v33 = vadd.s32 8, %v2597_v32  ;;  %v110_v34 = vand.u32 7, %v2597_v32 }
   0xa   :  { %2089 = vmatprep.mubr.bf16.mxu1 %v31_v21  ;;  %v2587_v28 = vld [vmem:[%s3042_s0 + $0x10] sm:$0xff]  ;;  %v2592_v29 = vld [vmem:[%s3042_s0 + $0x18] sm:$0xff]  ;;  %v2609_v37 = vadd.s32 16, %v2597_v32  ;;  %v2617_v40 = vadd.s32 24, %v2597_v32  ;;  %v94_v44 = vadd.s32 32, %v2597_v32  ;;  %v95_v45 = vadd.s32 40, %v2597_v32 }
   0xb   :  { %528 = vmatpush1.bf16.msra.mxu0 %v2396_v9  ;;  %2078 = vmatpush3.bf16.msra.mxu1 %v2395_v8  ;;  %v32_v30 = vpack.c.bf16 %v2592_v29, %v2587_v28  ;;  %v117_v35 = vand.u32 7, %v2600_v33  ;;  %vm300_vm0 = vcmp.eq.s32.totalorder %v110_v34, %v2604_v36  ;;  %v96_v49 = vadd.s32 48, %v2597_v32 }
   0xc   :  { %529 = vmatprep.subr.bf16.mxu0 %v2397_v10  ;;  %2079 = vmatprep.subr.bf16.mxu1 %v2399_v11  ;;  %v124_v42 = vand.u32 7, %v2609_v37  ;;  %v131_v43 = vand.u32 7, %v2617_v40  ;;  %v138_v47 = vand.u32 7, %v94_v44  ;;  %v145_v48 = vand.u32 7, %v95_v45 }
   0xd   :  { %vm301_vm1 = vcmp.eq.s32.totalorder %v117_v35, %v2604_v36  ;;  %v97_v51 = vadd.s32 56, %v2597_v32  ;;  %v152_v52 = vand.u32 7, %v96_v49  ;;  %v98_v54 = vadd.s32 64, %v2597_v32 }
   0xe   :  { %vm2612_vm2 = vmpackc.low %vm301_vm1, %vm300_vm0  ;;  %vm302_vm3 = vcmp.eq.s32.totalorder %v124_v42, %v2604_v36  ;;  %vm303_vm4 = vcmp.eq.s32.totalorder %v131_v43, %v2604_v36  ;;  %vm304_vm6 = vcmp.eq.s32.totalorder %v138_v47, %v2604_v36  ;;  %vm305_vm7 = vcmp.eq.s32.totalorder %v145_v48, %v2604_v36 }
   0xf   :  { %530 = vmatpush1.bf16.msra.mxu0 %v2400_v12  ;;  %2080 = vmatpush3.bf16.msra.mxu1 %v2399_v11  ;;  %vm2629_vm5 = vmpackc.low %vm303_vm4, %vm302_vm3  ;;  %v159_v53 = vand.u32 7, %v97_v51  ;;  %vm306_vm9 = vcmp.eq.s32.totalorder %v152_v52, %v2604_v36  ;;  %v99_v55 = vadd.s32 72, %v2597_v32  ;;  %v166_v57 = vand.u32 7, %v98_v54 }
  0x10   :  { %531 = vmatprep.subr.bf16.mxu0 %v2401_v13  ;;  %2081 = vmatprep.subr.bf16.mxu1 %v2403_v14  ;;  %vm2640_vm8 = vmpackc.low %vm305_vm7, %vm304_vm6  ;;  %v100_v59 = vadd.s32 80, %v2597_v32  ;;  %v101_v60 = vadd.s32 88, %v2597_v32  ;;  %v102_v0 = vadd.s32 96, %v2597_v32  ;;  %v103_v2 = vadd.s32 104, %v2597_v32 }
  0x11   :  { %vm307_vm10 = vcmp.eq.s32.totalorder %v159_v53, %v2604_v36  ;;  %v173_v58 = vand.u32 7, %v99_v55  ;;  %vm308_vm12 = vcmp.eq.s32.totalorder %v166_v57, %v2604_v36  ;;  %v104_v6 = vadd.s32 112, %v2597_v32 }
  0x12   :  { %vm2653_vm11 = vmpackc.low %vm307_vm10, %vm306_vm9  ;;  %v180_v62 = vand.u32 7, %v100_v59  ;;  %v187_v63 = vand.u32 7, %v101_v60  ;;  %v194_v4 = vand.u32 7, %v102_v0  ;;  %v201_v5 = vand.u32 7, %v103_v2 }
  0x13   :  { %532 = vmatpush1.bf16.msra.mxu0 %v2404_v15  ;;  %2082 = vmatpush3.bf16.msra.mxu1 %v2403_v14  ;;  %vm309_vm13 = vcmp.eq.s32.totalorder %v173_v58, %v2604_v36  ;;  %v105_v7 = vadd.s32 120, %v2597_v32  ;;  %v208_v9 = vand.u32 7, %v104_v6  ;;  %v3068_v11 = vmov 0 }
  0x14   :  { %533 = vmatprep.subr.bf16.mxu0 %v2405_v16  ;;  %2083 = vmatprep.subr.bf16.mxu1 %v2407_v17  ;;  %vm2665_vm14 = vmpackc.low %vm309_vm13, %vm308_vm12  ;;  %vm310_vm15 = vcmp.eq.s32.totalorder %v180_v62, %v2604_v36  ;;  %vm311_vm0 = vcmp.eq.s32.totalorder %v187_v63, %v2604_v36  ;;  %vm312_vm3 = vcmp.eq.s32.totalorder %v194_v4, %v2604_v36  ;;  %vm3051_vm12 = vmmov 0  }
  0x15   :  { %vm2677_vm1 = vmpackc.low %vm311_vm0, %vm310_vm15  ;;  %vm313_vm4 = vcmp.eq.s32.totalorder %v201_v5, %v2604_v36  ;;  %v215_v10 = vand.u32 7, %v105_v7  ;;  %vm314_vm7 = vcmp.eq.s32.totalorder %v208_v9, %v2604_v36  ;;  %v2457_v12 = vmov 0.0  }
  0x16   :  { %vm2689_vm6 = vmpackc.low %vm313_vm4, %vm312_vm3  ;;  %v352_v13 = vand.u32 7, %v2604_v36  ;;  %v2458_v15 = vmov 1.0   ;;  %v42_v16 = vand.u32 15, %v2597_v32  ;;  %vm629_vm15 = vcmask 1040384  }
  0x17   :  { %534 = vmatpush1.bf16.msra.mxu0 %v2408_v20  ;;  %2084 = vmatpush3.bf16.msra.mxu1 %v2407_v17  ;;  %vm315_vm9 = vcmp.eq.s32.totalorder %v215_v10, %v2604_v36  ;;  %vm3049_vm3 = vcmask 1046528   ;;  %v56_v49 = vand.u32 15, %v2609_v37  ;;  %v63_v60 = vand.u32 15, %v2617_v40 }
  0x18   :  { %535 = vmatprep.subr.bf16.mxu0 %v2409_v22  ;;  %2085 = vmatprep.subr.bf16.mxu1 %v2411_v23  ;;  %vm2699_vm10 = vmpackc.low %vm315_vm9, %vm314_vm7  ;;  %vm2714_vm13 = vcmp.eq.s32.totalorder %v352_v13, %v2597_v32  ;;  %vm2724_vm0 = vcmp.ne.s32.totalorder %v42_v16, 0 }
  0x19   :  { %v3069_v11 = vsel %vm2699_vm10, 4294967295, %v3068_v11  ;;  %vm2743_vm7 = vcmp.ne.s32.totalorder %v56_v49, 0  ;;  %vm2751_vm9 = vcmp.ne.s32.totalorder %v63_v60, 15 }
  0x1b   :  { %536 = vmatpush1.bf16.msra.mxu0 %v2412_v24  ;;  %2086 = vmatpush3.bf16.msra.mxu1 %v2411_v23 }
  0x1c   :  { %537 = vmatprep.subr.bf16.mxu0 %v2413_v25  ;;  %2087 = vmatprep.subr.bf16.mxu1 %v2415_v26 }
  0x1f   :  { %538 = vmatpush1.bf16.msra.mxu0 %v2416_v27  ;;  %2088 = vmatpush3.bf16.msra.mxu1 %v2415_v26 }
  0x20   :  { %2283 = vmatprep.subr.bf16.mxu0 %v2454_v38  ;;  %2128 = vmatprep.subr.mxu1 %v2457_v12 }
  0x22   :  { %556 = vmatmul.mubr.bf16.vlgmr.msra.gmra.mrb[0].mxu0 %v31_v21  ;;  %2090 = vmatmul.mubr.bf16.vlgmr.msra.gmra.mrb[0].mxu1 %v32_v30  ;;  %v49_v21 = vand.u32 15, %v2600_v33 }
  0x23   :  { %565 = vmatprep.mubr.bf16.mxu0 %v2453_v1  ;;  %2285 = vmatpush3.bf16.msk.msra.mxu0 %vm2612_vm2, %v2455_v41 }
  0x24   :  { %2286 = vmatprep.subr.bf16.mxu0 %v2454_v38  ;;  %2130 = vmatprep.mubr.msk.f32.mxu1 %vm3051_vm12, %v2457_v12  ;;  %vm2731_vm4 = vcmp.ne.s32.totalorder %v49_v21, 15 }
  0x25   :  { %2129 = vmatpush3.msk.msra.mxu1 %vm2714_vm13, %v2458_v15 }
  0x26   :  { %2307 = vmatprep.subr.bf16.mxu1 %v2454_v38 }
  0x27   :  { %2288 = vmatpush3.bf16.msk.msra.mxu0 %vm2629_vm5, %v2455_v41 }
  0x28   :  { %2289 = vmatprep.subr.bf16.mxu0 %v2454_v38 }
  0x2a   :  { %566 = vmatmul.mubr.bf16.gmra.mrb[4].mxu0 %v32_v30 }
  0x2b   :  { %2291 = vmatpush3.bf16.msk.msra.mxu0 %vm2640_vm8, %v2455_v41  ;;  %2125 = vmatprep.mubr.msk.f32.mxu0 %vm3051_vm12, %v2457_v12 }
  0x2c   :  { %2292 = vmatprep.subr.bf16.mxu0 %v2454_v38 }
  0x2f   :  { %2294 = vmatpush3.bf16.msk.msra.mxu0 %vm2653_vm11, %v2455_v41 }
  0x30   :  { %2295 = vmatprep.subr.bf16.mxu0 %v2454_v38 }
  0x33   :  { %2297 = vmatpush3.bf16.msk.msra.mxu0 %vm2665_vm14, %v2455_v41 }
  0x34   :  { %2298 = vmatprep.subr.bf16.mxu0 %v2454_v38 }
  0x37   :  { %2300 = vmatpush3.bf16.msk.msra.mxu0 %vm2677_vm1, %v2455_v41 }
  0x38   :  { %2301 = vmatprep.subr.bf16.mxu0 %v2454_v38 }
  0x3b   :  { %2303 = vmatpush3.bf16.msk.msra.mxu0 %vm2689_vm6, %v2455_v41 }
  0x3c   :  { %2304 = vmatprep.subr.bf16.mxu0 %v2454_v38 }
  0x3f   :  { %2306 = vmatpush3.bf16.msk.msra.mxu0 %vm2699_vm10, %v2455_v41 }
  0x40   :  { %2168 = vmatprep.subr.mxu0 %v2457_v12 }
  0xf5   :  { %v557_v17 = vpop.f32.mrb[0].mxu0  ;;  %v2091_v20 = vpop.f32.mrb[0].mxu1 }
  0xf6   :  { %v630_v22 = vrot.slane %v557_v17, 7  ;;  %v559_v24 = vpop.f32.mrb[1].mxu0  ;;  %v610_v25 = vpop.f32.mrb[1].mxu1  ;;  %v654_v26 = vrot.slane %v2091_v20, 1 }
  0xf7   :  { %v651_v27 = vrot.slane %v610_v25, 1  ;;  %v561_v30 = vpop.f32.mrb[2].mxu0  ;;  %v2092_v31 = vpop.f32.mrb[2].mxu1 }
  0xf8   :  { %v641_v34 = vsel %vm629_vm15, 0.0, %v630_v22  ;;  %v631_v35 = vrot.slane %v561_v30, 7  ;;  %v656_v36 = vrot.slane %v2092_v31, 1  ;;  %v563_v42 = vpop.f32.mrb[3].mxu0  ;;  %v613_v43 = vpop.f32.mrb[3].mxu1 }
  0xf9   :  { %v642_v33 = vsel %vm2724_vm0, %v641_v34, 0.0  ;;  %v652_v45 = vrot.slane %v613_v43, 1  ;;  %v2799_v43 = vsub.s32 0, %v2597_v32 }
  0xfa   :  { %v667_v47 = vadd.f32 %v642_v33, %v559_v24  ;;  %v632_v48 = vsel %vm629_vm15, %v630_v22, %v631_v35  ;;  %v657_v51 = vsel %vm3049_vm3, %v654_v26, %v656_v36  ;;  %v662_v6 = vsel %vm3049_vm3, %v656_v36, 0.0 }
  0xfb   :  { %v668_v52 = vadd.f32 %v632_v48, %v563_v42  ;;  %v653_v53 = vsel %vm3049_vm3, %v651_v27, %v652_v45  ;;  %v655_v54 = vsel %vm3049_vm3, %v652_v45, %v654_v26  ;;  %v666_v20 = vsel %vm2751_vm9, %v662_v6, 0.0  ;;  %v2424_v6 = vld [vmem:[%s3043_s4 + $0x20] ss:$12 sps:$4 sm:$0xff]  }
  0xfc   :  { %v664_v55 = vsel %vm2731_vm4, %v655_v54, 0.0  ;;  %v671_v57 = vadd.f32 %v667_v47, %v653_v53  ;;  %vm3050_vm3 = vcmask 64512  }
  0xfd   :  { %v672_v58 = vadd.f32 %v668_v52, %v664_v55  ;;  %v567_v59 = vpop.f32.mrb[4].mxu0 }
  0xfe   :  { %v633_v62 = vrot.slane %v567_v59, 7  ;;  %v569_v37 = vpop.f32.mrb[5].mxu0 }
  0xff   :  { %v571_v0 = vpop.f32.mrb[6].mxu0  ;;  %v675_v17 = vadd.f32 %v672_v58, %v671_v57 }
 0x100   :  { %v634_v2 = vsel %vm629_vm15, %v631_v35, %v633_v62  ;;  %v635_v4 = vrot.slane %v571_v0, 7  ;;  %v573_v5 = vpop.f32.mrb[7].mxu0 }
 0x101   :  { %v644_v7 = vsel %vm2743_vm7, %v634_v2, 0.0 }
 0x102   :  { %v669_v40 = vadd.f32 %v644_v7, %v569_v37  ;;  %v636_v10 = vsel %vm629_vm15, %v633_v62, %v635_v4  ;;  %v2428_v7 = vld [vmem:[%s3043_s4 + $0x38] ss:$12 sps:$4 sm:$0xff]  }
 0x103   :  { %v670_v13 = vadd.f32 %v636_v10, %v573_v5  ;;  %v2420_v5 = vld [vmem:[%s3043_s4 + $0x8] ss:$12 sps:$4 sm:$0xff]  }
 0x104   :  { %v673_v16 = vadd.f32 %v669_v40, %v657_v51  ;;  %v2432_v40 = vld [vmem:[%s3043_s4 + $0x50] ss:$12 sps:$4 sm:$0xff]   ;;  %v2436_v10 = vld [vmem:[%s3043_s4 + $0x68] ss:$12 sps:$4 sm:$0xff]  }
 0x105   :  { %v674_v21 = vadd.f32 %v670_v13, %v666_v20 }
 0x106   :  { %v676_v22 = vadd.f32 %v675_v17, %v673_v16 }
 0x108   :  { %v677_v24 = vadd.f32 %v676_v22, %v674_v21 }
 0x10a   :  { %v678_v25 = vrot.slane %v677_v24, 4 }
 0x10c   :  { %v679_v26 = vadd.f32 %v678_v25, %v677_v24  ;;  %v2419_v25 = vld [vmem:[%s3043_s4 + $0x4] ss:$12 sps:$4 sm:$0xff]  }
 0x10e   :  { %v680_v27 = vrot.slane %v679_v26, 2 }
 0x110   :  { %v681_v30 = vadd.f32 %v680_v27, %v679_v26  ;;  %v998_v26 = vld [vmem:[%s3045_s3] sm:$0x1] }
 0x111   :  { %v2417_v27 = vld [vmem:[%s3043_s4] ss:$12 sps:$4 sm:$0xff]  }
 0x112   :  { %v682_v31 = vrot.slane %v681_v30, 1 }
 0x114   :  { %v683_v34 = vadd.f32 %v682_v31, %v681_v30  ;;  %v2423_v30 = vld [vmem:[%s3043_s4 + $0x1c] ss:$12 sps:$4 sm:$0xff]   ;;  %v2421_v31 = vld [vmem:[%s3043_s4 + $0x18] ss:$12 sps:$4 sm:$0xff]  }
 0x116   :  { %2126 = vmatmul.mubr.f32.vlgmr.msra.gmra.mrb[8].mxu0 %v683_v34  ;;  %v2427_v34 = vld [vmem:[%s3043_s4 + $0x34] ss:$12 sps:$4 sm:$0xff]  }
 0x117   :  { %2169 = vmatpush3.msk.msra.mxu0 %vm2714_vm13, %v2458_v15  ;;  %2170 = vmatprep.mubr.msk.f32.mxu0 %vm3051_vm12, %v2457_v12 }
 0x118   :  { %2173 = vmatprep.subr.mxu0 %v2457_v12 }
 0x1e9   :  { %v750_v35 = vpop.f32.mrb[8].mxu0 }
 0x1ea   :  { %v754_v36 = vmul.f32 0.001953125, %v750_v35  ;;  %v2127_v42 = vpop.f32.mrb[9].mxu0  ;;  %v2425_v35 = vld [vmem:[%s3043_s4 + $0x30] ss:$12 sps:$4 sm:$0xff]  }
 0x1eb   :  { %v2429_v42 = vld [vmem:[%s3043_s4 + $0x48] ss:$12 sps:$4 sm:$0xff]  }
 0x1ec   :  { %2131 = vmatmul.mubr.msk.f32.vlgmr.msra.gmra.mrb[4].mxu1 %vm3050_vm3, %v754_v36  ;;  %v2431_v36 = vld [vmem:[%s3043_s4 + $0x4c] ss:$12 sps:$4 sm:$0xff]  }
 0x1ed   :  { %2309 = vmatpush3.bf16.msk.msra.mxu1 %vm2612_vm2, %v2455_v41  ;;  %2165 = vmatprep.mubr.msk.f32.mxu1 %vm3051_vm12, %v2457_v12 }
 0x1ee   :  { %2310 = vmatprep.subr.bf16.mxu1 %v2454_v38 }
 0x1f1   :  { %2312 = vmatpush3.bf16.msk.msra.mxu1 %vm2629_vm5, %v2455_v41 }
 0x1f2   :  { %2313 = vmatprep.subr.bf16.mxu1 %v2454_v38 }
 0x1f5   :  { %2315 = vmatpush3.bf16.msk.msra.mxu1 %vm2640_vm8, %v2455_v41 }
 0x1f6   :  { %2316 = vmatprep.subr.bf16.mxu1 %v2454_v38 }
 0x1f9   :  { %2318 = vmatpush3.bf16.msk.msra.mxu1 %vm2653_vm11, %v2455_v41 }
 0x1fa   :  { %2319 = vmatprep.subr.bf16.mxu1 %v2454_v38 }
 0x1fd   :  { %2321 = vmatpush3.bf16.msk.msra.mxu1 %vm2665_vm14, %v2455_v41 }
 0x1fe   :  { %2322 = vmatprep.subr.bf16.mxu1 %v2454_v38 }
 0x201   :  { %2324 = vmatpush3.bf16.msk.msra.mxu1 %vm2677_vm1, %v2455_v41 }
 0x202   :  { %2325 = vmatprep.subr.bf16.mxu1 %v2454_v38 }
 0x205   :  { %2327 = vmatpush3.bf16.msk.msra.mxu1 %vm2689_vm6, %v2455_v41 }
 0x206   :  { %2328 = vmatprep.subr.bf16.mxu1 %v2454_v38 }
 0x209   :  { %2330 = vmatpush3.bf16.msk.msra.mxu1 %vm2699_vm10, %v2455_v41 }
 0x20a   :  { %2178 = vmatprep.subr.bf16.mxu1 %v2420_v5 }
 0x2bf   :  { %v825_v33 = vpop.f32.mrb[4].mxu1 }
 0x2c0   :  { %v832_v45 = vrot.slane %v825_v33, %v2799_v43  ;;  %v2132_v47 = vpop.f32.mrb[5].mxu1  ;;  %v2435_v33 = vld [vmem:[%s3043_s4 + $0x64] ss:$12 sps:$4 sm:$0xff]  }
 0x2c1   :  { %v2439_v47 = vld [vmem:[%s3043_s4 + $0x7c] ss:$12 sps:$4 sm:$0xff]  }
 0x2c2   :  { %v2802_v48 = vsub.f32 %v671_v57, %v832_v45  ;;  %v2804_v49 = vsub.f32 %v672_v58, %v832_v45  ;;  %v2806_v51 = vsub.f32 %v673_v16, %v832_v45  ;;  %v2808_v52 = vsub.f32 %v674_v21, %v832_v45  ;;  %v921_v21 = vld [vmem:[%s3044_s2] sm:$0x1] }
 0x2c3   :  { %v2433_v45 = vld [vmem:[%s3043_s4 + $0x60] ss:$12 sps:$4 sm:$0xff]  }
 0x2c4   :  { %v837_v53 = vmul.f32 %v2802_v48, %v2802_v48  ;;  %v838_v54 = vmul.f32 %v2804_v49, %v2804_v49  ;;  %v839_v32 = vmul.f32 %v2806_v51, %v2806_v51  ;;  %v840_v57 = vmul.f32 %v2808_v52, %v2808_v52 }
 0x2c6   :  { %v841_v55 = vadd.f32 %v838_v54, %v837_v53  ;;  %v2437_v53 = vld [vmem:[%s3043_s4 + $0x78] ss:$12 sps:$4 sm:$0xff]   ;;  %v2440_v54 = vld [vmem:[%s3043_s4 + $0x80] ss:$12 sps:$4 sm:$0xff]  }
 0x2c8   :  { %v842_v59 = vadd.f32 %v841_v55, %v839_v32  ;;  %v2443_v32 = vld [vmem:[%s3043_s4 + $0x94] ss:$12 sps:$4 sm:$0xff]   ;;  %v2441_v55 = vld [vmem:[%s3043_s4 + $0x90] ss:$12 sps:$4 sm:$0xff]  }
 0x2ca   :  { %v843_v58 = vadd.f32 %v842_v59, %v840_v57  ;;  %v2444_v57 = vld [vmem:[%s3043_s4 + $0x98] ss:$12 sps:$4 sm:$0xff]  }
 0x2cb   :  { %v2447_v59 = vld [vmem:[%s3043_s4 + $0xac] ss:$12 sps:$4 sm:$0xff]  }
 0x2cc   :  { %v844_v60 = vrot.slane %v843_v58, 4 }
 0x2ce   :  { %v845_v62 = vadd.f32 %v844_v60, %v843_v58  ;;  %v2445_v58 = vld [vmem:[%s3043_s4 + $0xa8] ss:$12 sps:$4 sm:$0xff]   ;;  %v2448_v60 = vld [vmem:[%s3043_s4 + $0xb0] ss:$12 sps:$4 sm:$0xff]  }
 0x2d0   :  { %v846_v37 = vrot.slane %v845_v62, 2 }
 0x2d2   :  { %v847_v0 = vadd.f32 %v846_v37, %v845_v62 }
 0x2d4   :  { %v848_v2 = vrot.slane %v847_v0, 1 }
 0x2d6   :  { %v849_v4 = vadd.f32 %v848_v2, %v847_v0 }
 0x2d8   :  { %2166 = vmatmul.mubr.f32.vlgmr.msra.gmra.mrb[6].mxu1 %v849_v4 }
 0x2d9   :  { %2179 = vmatpush3.bf16.msra.mxu1 %v2420_v5 }
 0x2da   :  { %2180 = vmatprep.subr.bf16.mxu1 %v2424_v6 }
 0x2dd   :  { %2181 = vmatpush3.bf16.msra.mxu1 %v2424_v6 }
 0x2de   :  { %2182 = vmatprep.subr.bf16.mxu1 %v2428_v7 }
 0x2e1   :  { %2183 = vmatpush3.bf16.msra.mxu1 %v2428_v7 }
 0x2e2   :  { %2184 = vmatprep.subr.bf16.mxu1 %v2432_v40 }
 0x2e5   :  { %2185 = vmatpush3.bf16.msra.mxu1 %v2432_v40 }
 0x2e6   :  { %2186 = vmatprep.subr.bf16.mxu1 %v2436_v10 }
 0x2e9   :  { %2187 = vmatpush3.bf16.msra.mxu1 %v2436_v10 }
 0x2ea   :  { %2188 = vmatprep.subr.bf16.mxu1 %v2440_v54 }
 0x2ed   :  { %2189 = vmatpush3.bf16.msra.mxu1 %v2440_v54 }
 0x2ee   :  { %2190 = vmatprep.subr.bf16.mxu1 %v2444_v57 }
 0x2f1   :  { %2191 = vmatpush3.bf16.msra.mxu1 %v2444_v57 }
 0x2f2   :  { %2192 = vmatprep.subr.bf16.mxu1 %v2448_v60 }
 0x2f5   :  { %2193 = vmatpush3.bf16.msra.mxu1 %v2448_v60 }
 0x2f6   :  { %2233 = vmatprep.subr.mxu1 %v2457_v12 }
 0x3ab   :  { %v916_v13 = vpop.f32.mrb[6].mxu1 }
 0x3ac   :  { %v920_v16 = vmul.f32 0.001953125, %v916_v13  ;;  %v2167_v17 = vpop.f32.mrb[7].mxu1 }
 0x3ae   :  { %v922_v20 = vadd.f32 1e-05, %v920_v16 }
 0x3b0   :  { %2449 = vrsqrt.f32 %v922_v20 }
 0x3ba   :  { %v2450_v22 = vpop.eup %2449 }
 0x3bb   :  { %v924_v24 = vmul.f32 %v2450_v22, %v921_v21 }
 0x3bd   :  { %2171 = vmatmul.mubr.msk.f32.vlgmr.msra.gmra.mrb[10].mxu0 %vm3050_vm3, %v924_v24 }
 0x3be   :  { %2174 = vmatpush3.msk.msra.mxu0 %vm2714_vm13, %v2458_v15  ;;  %2175 = vmatprep.mubr.msk.f32.mxu0 %vm3051_vm12, %v2457_v12 }
 0x3bf   :  { %1254 = vmatprep.subr.bf16.mxu0 %v2419_v25 }
 0x3c1   :  { %2176 = vmatmul.mubr.msk.f32.vlgmr.msra.gmra.mrb[12].mxu0 %vm3050_vm3, %v998_v26  ;;  %vm3080_vm3 = vcmask 1046528  }
 0x3c2   :  { %1255 = vmatpush1.bf16.msra.mxu0 %v2417_v27  ;;  %1286 = vmatprep.mubr.bf16.mxu0 %v2453_v1 }
 0x3c3   :  { %1256 = vmatprep.subr.bf16.mxu0 %v2423_v30 }
 0x3c6   :  { %1257 = vmatpush1.bf16.msra.mxu0 %v2421_v31 }
 0x3c7   :  { %1258 = vmatprep.subr.bf16.mxu0 %v2427_v34 }
 0x3ca   :  { %1259 = vmatpush1.bf16.msra.mxu0 %v2425_v35 }
 0x3cb   :  { %1260 = vmatprep.subr.bf16.mxu0 %v2431_v36 }
 0x3ce   :  { %1261 = vmatpush1.bf16.msra.mxu0 %v2429_v42 }
 0x3cf   :  { %1262 = vmatprep.subr.bf16.mxu0 %v2435_v33 }
 0x3d2   :  { %1263 = vmatpush1.bf16.msra.mxu0 %v2433_v45 }
 0x3d3   :  { %1264 = vmatprep.subr.bf16.mxu0 %v2439_v47 }
 0x3d6   :  { %1265 = vmatpush1.bf16.msra.mxu0 %v2437_v53 }
 0x3d7   :  { %1266 = vmatprep.subr.bf16.mxu0 %v2443_v32 }
 0x3da   :  { %1267 = vmatpush1.bf16.msra.mxu0 %v2441_v55 }
 0x3db   :  { %1268 = vmatprep.subr.bf16.mxu0 %v2447_v59 }
 0x3de   :  { %1269 = vmatpush1.bf16.msra.mxu0 %v2445_v58 }
 0x3df   :  { %2331 = vmatprep.subr.bf16.mxu0 %v2454_v38 }
 0x490   :  { %v994_v62 = vpop.f32.mrb[10].mxu0 }
 0x491   :  { %v1075_v37 = vrot.slane %v994_v62, %v2799_v43  ;;  %v2172_v0 = vpop.f32.mrb[11].mxu0 }
 0x493   :  { %v1076_v2 = vmul.f32 %v1075_v37, %v2802_v48  ;;  %v1077_v5 = vmul.f32 %v1075_v37, %v2804_v49  ;;  %v1078_v6 = vmul.f32 %v1075_v37, %v2806_v51  ;;  %v1079_v7 = vmul.f32 %v1075_v37, %v2808_v52 }
 0x494   :  { %v1068_v4 = vpop.f32.mrb[12].mxu0 }
 0x495   :  { %v1083_v40 = vrot.slane %v1068_v4, %v2799_v43  ;;  %v2177_v10 = vpop.f32.mrb[13].mxu0 }
 0x497   :  { %v1084_v13 = vadd.f32 %v1083_v40, %v1076_v2  ;;  %v1085_v16 = vadd.f32 %v1083_v40, %v1077_v5  ;;  %v1086_v17 = vadd.f32 %v1083_v40, %v1078_v6  ;;  %v1087_v20 = vadd.f32 %v1083_v40, %v1079_v7 }
 0x499   :  { %v1088_v21 = vmax.f32 %v1084_v13, 0.0  ;;  %v1089_v22 = vmax.f32 %v1085_v16, 0.0  ;;  %v1090_v24 = vmax.f32 %v1086_v17, 0.0  ;;  %v1091_v25 = vmax.f32 %v1087_v20, 0.0 }
 0x49b   :  { %v1092_v26 = vpack.c.bf16 %v1089_v22, %v1088_v21  ;;  %v1093_v48 = vpack.c.bf16 %v1091_v25, %v1090_v24 }
 0x49d   :  { %1287 = vmatmul.mubr.bf16.vlgmr.msra.gmra.mrb[16].mxu0 %v1092_v26  ;;  %2194 = vmatprep.mubr.bf16.mxu1 %v1092_v26 }
 0x49e   :  { %2195 = vmatmul.mubr.bf16.vlgmr.msra.gmra.mrb[8].mxu1 %v1093_v48  ;;  %1296 = vmatprep.mubr.bf16.mxu0 %v2453_v1 }
 0x49f   :  { %2333 = vmatpush3.bf16.msk.msra.mxu0 %vm2612_vm2, %v2455_v41  ;;  %2234 = vmatpush3.msk.msra.mxu1 %vm2714_vm13, %v2458_v15 }
 0x4a0   :  { %2334 = vmatprep.subr.bf16.mxu0 %v2454_v38  ;;  %2235 = vmatprep.mubr.msk.f32.mxu1 %vm3051_vm12, %v2457_v12 }
 0x4a1   :  { %2355 = vmatprep.subr.bf16.mxu1 %v2454_v38 }
 0x4a3   :  { %2336 = vmatpush3.bf16.msk.msra.mxu0 %vm2629_vm5, %v2455_v41 }
 0x4a4   :  { %2337 = vmatprep.subr.bf16.mxu0 %v2454_v38 }
 0x4a5   :  { %1297 = vmatmul.mubr.bf16.gmra.mrb[20].mxu0 %v1093_v48 }
 0x4a6   :  { %2230 = vmatprep.mubr.msk.f32.mxu0 %vm3051_vm12, %v2457_v12  ;;  %vm3081_vm12 = vmmov %vm3080_vm3 }
 0x4a7   :  { %2339 = vmatpush3.bf16.msk.msra.mxu0 %vm2640_vm8, %v2455_v41 }
 0x4a8   :  { %2340 = vmatprep.subr.bf16.mxu0 %v2454_v38 }
 0x4ab   :  { %2342 = vmatpush3.bf16.msk.msra.mxu0 %vm2653_vm11, %v2455_v41 }
 0x4ac   :  { %2343 = vmatprep.subr.bf16.mxu0 %v2454_v38 }
 0x4af   :  { %2345 = vmatpush3.bf16.msk.msra.mxu0 %vm2665_vm14, %v2455_v41 }
 0x4b0   :  { %2346 = vmatprep.subr.bf16.mxu0 %v2454_v38 }
 0x4b3   :  { %2348 = vmatpush3.bf16.msk.msra.mxu0 %vm2677_vm1, %v2455_v41 }
 0x4b4   :  { %2349 = vmatprep.subr.bf16.mxu0 %v2454_v38 }
 0x4b7   :  { %2351 = vmatpush3.bf16.msk.msra.mxu0 %vm2689_vm6, %v2455_v41 }
 0x4b8   :  { %2352 = vmatprep.subr.bf16.mxu0 %v2454_v38 }
 0x4bb   :  { %2354 = vmatpush3.bf16.msk.msra.mxu0 %vm2699_vm10, %v2455_v41  ;;  %vm3082_vm10 = vmmov %vm3080_vm3 }
 0x4bc   :  { %2273 = vmatprep.subr.mxu0 %v2457_v12 }
 0x570   :  { %v1288_v1 = vpop.f32.mrb[16].mxu0 }
 0x571   :  { %v1360_v49 = vrot.slane %v1288_v1, 7  ;;  %v1290_v51 = vpop.f32.mrb[17].mxu0  ;;  %v2196_v52 = vpop.f32.mrb[8].mxu1 }
 0x572   :  { %v1292_v27 = vpop.f32.mrb[18].mxu0  ;;  %v1341_v30 = vpop.f32.mrb[9].mxu1  ;;  %v1383_v33 = vrot.slane %v2196_v52, 1 }
 0x573   :  { %v1371_v31 = vsel %vm629_vm15, 0.0, %v1360_v49  ;;  %v1361_v34 = vrot.slane %v1292_v27, 7  ;;  %v1294_v35 = vpop.f32.mrb[19].mxu0  ;;  %v2197_v36 = vpop.f32.mrb[10].mxu1  ;;  %v1380_v54 = vrot.slane %v1341_v30, 1 }
 0x574   :  { %v1372_v42 = vsel %vm2724_vm0, %v1371_v31, 0.0  ;;  %v1385_v45 = vrot.slane %v2197_v36, 1  ;;  %v1344_v47 = vpop.f32.mrb[11].mxu1  ;;  %vm3083_vm0 = vmmov %vm3080_vm3 }
 0x575   :  { %v1396_v53 = vadd.f32 %v1372_v42, %v1290_v51  ;;  %v1362_v32 = vsel %vm629_vm15, %v1360_v49, %v1361_v34  ;;  %v1381_v55 = vrot.slane %v1344_v47, 1 }
 0x576   :  { %v1397_v57 = vadd.f32 %v1362_v32, %v1294_v35  ;;  %v1386_v59 = vsel %vm3080_vm3, %v1383_v33, %v1385_v45  ;;  %v1391_v10 = vsel %vm3083_vm0, %v1385_v45, 0.0 }
 0x577   :  { %v1382_v58 = vsel %vm3081_vm12, %v1380_v54, %v1381_v55  ;;  %v1384_v60 = vsel %vm3082_vm10, %v1381_v55, %v1383_v33  ;;  %v1395_v22 = vsel %vm2751_vm9, %v1391_v10, 0.0  ;;  %vm3084_vm10 = vmmov 0  }
 0x578   :  { %v1393_v62 = vsel %vm2731_vm4, %v1384_v60, 0.0  ;;  %v1400_v23 = vadd.f32 %v1396_v53, %v1382_v58  ;;  %v1298_v37 = vpop.f32.mrb[20].mxu0  ;;  %vm3085_vm12 = vcmask 64512   ;;  %v1649_v58 = vld [vmem:[%s3046_s5] sm:$0x1] }
 0x579   :  { %v1401_v0 = vadd.f32 %v1397_v57, %v1393_v62  ;;  %v1363_v2 = vrot.slane %v1298_v37, 7  ;;  %v1300_v4 = vpop.f32.mrb[21].mxu0 }
 0x57a   :  { %v1302_v5 = vpop.f32.mrb[22].mxu0 }
 0x57b   :  { %v1364_v6 = vsel %vm629_vm15, %v1361_v34, %v1363_v2  ;;  %v1365_v7 = vrot.slane %v1302_v5, 7  ;;  %v1304_v40 = vpop.f32.mrb[23].mxu0  ;;  %v1404_v21 = vadd.f32 %v1401_v0, %v1400_v23 }
 0x57c   :  { %v1374_v13 = vsel %vm2743_vm7, %v1364_v6, 0.0 }
 0x57d   :  { %v1398_v16 = vadd.f32 %v1374_v13, %v1300_v4  ;;  %v1366_v17 = vsel %vm629_vm15, %v1363_v2, %v1365_v7 }
 0x57e   :  { %v1399_v44 = vadd.f32 %v1366_v17, %v1304_v40 }
 0x57f   :  { %v1402_v20 = vadd.f32 %v1398_v16, %v1386_v59 }
 0x580   :  { %v1403_v24 = vadd.f32 %v1399_v44, %v1395_v22 }
 0x581   :  { %v1405_v25 = vadd.f32 %v1404_v21, %v1402_v20 }
 0x583   :  { %v1406_v26 = vadd.f32 %v1405_v25, %v1403_v24 }
 0x585   :  { %v1407_v48 = vrot.slane %v1406_v26, 4 }
 0x587   :  { %v1408_v1 = vadd.f32 %v1407_v48, %v1406_v26 }
 0x589   :  { %v1409_v49 = vrot.slane %v1408_v1, 2 }
 0x58b   :  { %v1410_v51 = vadd.f32 %v1409_v49, %v1408_v1 }
 0x58d   :  { %v1411_v52 = vrot.slane %v1410_v51, 1 }
 0x58f   :  { %v1412_v27 = vadd.f32 %v1411_v52, %v1410_v51 }
 0x591   :  { %2231 = vmatmul.mubr.f32.vlgmr.msra.gmra.mrb[14].mxu0 %v1412_v27 }
 0x592   :  { %2274 = vmatpush3.msk.msra.mxu0 %vm2714_vm13, %v2458_v15  ;;  %2275 = vmatprep.mubr.msk.f32.mxu0 %vm3084_vm10, %v2457_v12 }
 0x593   :  { %2278 = vmatprep.subr.mxu0 %v2457_v12 }
 0x664   :  { %v1479_v63 = vpop.f32.mrb[14].mxu0 }
 0x665   :  { %v1483_v9 = vmul.f32 0.001953125, %v1479_v63  ;;  %v2232_v30 = vpop.f32.mrb[15].mxu0 }
 0x667   :  { %2236 = vmatmul.mubr.msk.f32.vlgmr.msra.gmra.mrb[12].mxu1 %vm3085_vm12, %v1483_v9 }
 0x668   :  { %2357 = vmatpush3.bf16.msk.msra.mxu1 %vm2612_vm2, %v2455_v41  ;;  %2270 = vmatprep.mubr.msk.f32.mxu1 %vm3084_vm10, %v2457_v12  ;;  %vm3086_vm2 = vnez %v3069_v11 }
 0x669   :  { %2358 = vmatprep.subr.bf16.mxu1 %v2454_v38 }
 0x66c   :  { %2360 = vmatpush3.bf16.msk.msra.mxu1 %vm2629_vm5, %v2455_v41  ;;  %vm3087_vm5 = vmmov %vm3085_vm12 }
 0x66d   :  { %2361 = vmatprep.subr.bf16.mxu1 %v2454_v38 }
 0x670   :  { %2363 = vmatpush3.bf16.msk.msra.mxu1 %vm2640_vm8, %v2455_v41  ;;  %vm3088_vm8 = vmmov %vm3087_vm5 }
 0x671   :  { %2364 = vmatprep.subr.bf16.mxu1 %v2454_v38 }
 0x674   :  { %2366 = vmatpush3.bf16.msk.msra.mxu1 %vm2653_vm11, %v2455_v41 }
 0x675   :  { %2367 = vmatprep.subr.bf16.mxu1 %v2454_v38 }
 0x678   :  { %2369 = vmatpush3.bf16.msk.msra.mxu1 %vm2665_vm14, %v2455_v41 }
 0x679   :  { %2370 = vmatprep.subr.bf16.mxu1 %v2454_v38 }
 0x67c   :  { %2372 = vmatpush3.bf16.msk.msra.mxu1 %vm2677_vm1, %v2455_v41 }
 0x67d   :  { %2373 = vmatprep.subr.bf16.mxu1 %v2454_v38 }
 0x680   :  { %2375 = vmatpush3.bf16.msk.msra.mxu1 %vm2689_vm6, %v2455_v41 }
 0x681   :  { %2376 = vmatprep.subr.bf16.mxu1 %v2454_v38 }
 0x684   :  { %2378 = vmatpush3.bf16.msk.msra.mxu1 %vm3086_vm2, %v2455_v41 }
 0x73a   :  { %v1553_v39 = vpop.f32.mrb[12].mxu1 }
 0x73b   :  { %v1560_v46 = vrot.slane %v1553_v39, %v2799_v43  ;;  %v2237_v50 = vpop.f32.mrb[13].mxu1 }
 0x73d   :  { %v1561_v56 = vsub.f32 %v1400_v23, %v1560_v46  ;;  %v1562_v61 = vsub.f32 %v1401_v0, %v1560_v46  ;;  %v1563_v3 = vsub.f32 %v1402_v20, %v1560_v46  ;;  %v1564_v31 = vsub.f32 %v1403_v24, %v1560_v46  ;;  %v1726_v23 = vld [vmem:[%s3047_s6] sm:$0x1] }
 0x73f   :  { %v1565_v34 = vmul.f32 %v1561_v56, %v1561_v56  ;;  %v1566_v35 = vmul.f32 %v1562_v61, %v1562_v61  ;;  %v1567_v36 = vmul.f32 %v1563_v3, %v1563_v3  ;;  %v1568_v8 = vmul.f32 %v1564_v31, %v1564_v31 }
 0x741   :  { %v1569_v42 = vadd.f32 %v1566_v35, %v1565_v34 }
 0x743   :  { %v1570_v33 = vadd.f32 %v1569_v42, %v1567_v36 }
 0x745   :  { %v1571_v45 = vadd.f32 %v1570_v33, %v1568_v8 }
 0x747   :  { %v1572_v38 = vrot.slane %v1571_v45, 4 }
 0x749   :  { %v1573_v47 = vadd.f32 %v1572_v38, %v1571_v45 }
 0x74b   :  { %v1574_v53 = vrot.slane %v1573_v47, 2 }
 0x74d   :  { %v1575_v11 = vadd.f32 %v1574_v53, %v1573_v47 }
 0x74f   :  { %v1576_v41 = vrot.slane %v1575_v11, 1 }
 0x751   :  { %v1577_v54 = vadd.f32 %v1576_v41, %v1575_v11 }
 0x753   :  { %2271 = vmatmul.mubr.f32.vlgmr.msra.gmra.mrb[14].mxu1 %v1577_v54 }
 0x826   :  { %v1644_v32 = vpop.f32.mrb[14].mxu1 }
 0x827   :  { %v1648_v55 = vmul.f32 0.001953125, %v1644_v32  ;;  %v2272_v57 = vpop.f32.mrb[15].mxu1 }
 0x829   :  { %v1650_v59 = vadd.f32 1e-05, %v1648_v55 }
 0x82b   :  { %2451 = vrsqrt.f32 %v1650_v59 }
 0x835   :  { %v2452_v60 = vpop.eup %2451 }
 0x836   :  { %v1652_v62 = vmul.f32 %v2452_v60, %v1649_v58 }
 0x838   :  { %2276 = vmatmul.mubr.msk.f32.vlgmr.msra.gmra.mrb[24].mxu0 %vm3087_vm5, %v1652_v62 }
 0x839   :  { %2279 = vmatpush3.msk.msra.mxu0 %vm2714_vm13, %v2458_v15  ;;  %2280 = vmatprep.mubr.msk.f32.mxu0 %vm3084_vm10, %v2457_v12 }
 0x83c   :  { %2281 = vmatmul.mubr.msk.f32.vlgmr.msra.gmra.mrb[26].mxu0 %vm3088_vm8, %v1726_v23 }
 0x90b   :  { %v1722_v37 = vpop.f32.mrb[24].mxu0 }
 0x90c   :  { %v1803_v0 = vrot.slane %v1722_v37, %v2799_v43  ;;  %v2277_v2 = vpop.f32.mrb[25].mxu0 }
 0x90e   :  { %v1804_v4 = vmul.f32 %v1803_v0, %v1561_v56  ;;  %v1805_v6 = vmul.f32 %v1803_v0, %v1562_v61  ;;  %v1806_v7 = vmul.f32 %v1803_v0, %v1563_v3  ;;  %v1807_v40 = vmul.f32 %v1803_v0, %v1564_v31 }
 0x90f   :  { %v1796_v5 = vpop.f32.mrb[26].mxu0 }
 0x910   :  { %v1811_v14 = vrot.slane %v1796_v5, %v2799_v43  ;;  %v2282_v15 = vpop.f32.mrb[27].mxu0 }
 0x912   :  { %v1812_v10 = vadd.f32 %v1811_v14, %v1804_v4  ;;  %v1813_v12 = vadd.f32 %v1811_v14, %v1805_v6  ;;  %v1814_v13 = vadd.f32 %v1811_v14, %v1806_v7  ;;  %v1815_v16 = vadd.f32 %v1811_v14, %v1807_v40 }
 0x914   :  { %v1816_v17 = vadd.f32 %v1812_v10, %v2554_v18  ;;  %v1817_v44 = vadd.f32 %v1813_v12, %v2559_v19  ;;  %v1818_v20 = vadd.f32 %v1814_v13, %v2587_v28  ;;  %v1819_v21 = vadd.f32 %v1815_v16, %v2592_v29 }
 0x916   :  { %v1820_v22 = vmax.f32 %v1816_v17, 0.0  ;;  %v1821_v24 = vmax.f32 %v1817_v44, 0.0  ;;  %v1822_v25 = vmax.f32 %v1818_v20, 0.0  ;;  %v1823_v26 = vmax.f32 %v1819_v21, 0.0 }
 0x918   :  { %1824 = vst [vmem:[%s3048_s7] sm:$0xff] %v1820_v22  ;;  %1825 = vst [vmem:[%s3048_s7 + $0x8] sm:$0xff] %v1821_v24 }
 0x919   :  { %1826 = vst [vmem:[%s3048_s7 + $0x10] sm:$0xff] %v1822_v25  ;;  %1827 = vst [vmem:[%s3048_s7 + $0x18] sm:$0xff] %v1823_v26 }

</bundles_post_ra>
